<compile_context>
chip_gen: v5e
topology: v5e:2x2
jax: 0.10.0
libtpu: 0.0.40
codegen_flags: <defaults>
</compile_context>

<pallas_src>
import jax
import jax.numpy as jnp
from jax import lax
from jax.experimental import pallas as pl
from jax.experimental.pallas import tpu as pltpu


# ---------------------------------------------------------------------------
# Shared in-kernel conv tile: K shifted MXU matmuls with f32 accumulation.
# ---------------------------------------------------------------------------
def _conv_tile(w_ref, x_ref, l_out):
    """Direct K-tap conv on one sample.

    w_ref: (K, C_out, C_in) in matmul dtype (bf16/f32), resident every step
    x_ref: (C_in, L) in the caller's dtype (cast in-kernel)
    returns (C_out, L_out) float32
    """
    k_taps = w_ref.shape[0]
    acc = None
    for k in range(k_taps):  # K is a small static int -> unrolled at trace time
        xk = x_ref[:, pl.ds(k, l_out)].astype(w_ref.dtype)          # (C_in, L_out)
        part = jnp.dot(w_ref[k], xk, preferred_element_type=jnp.float32)
        acc = part if acc is None else acc + part
    return acc


# ---------------------------------------------------------------------------
# Pass A: conv tile + per-tile per-channel (sum, M2) partial statistics.
# ---------------------------------------------------------------------------
def _conv_stats_kernel(w_ref, x_ref, sum_ref, m2_ref):
    """sum_ref / m2_ref: (C_out, 1) f32 partials for this sample."""
    k_taps = w_ref.shape[0]
    l_out = x_ref.shape[1] - k_taps + 1
    y = _conv_tile(w_ref, x_ref, l_out)                              # (C_out, L_out) f32
    s = jnp.sum(y, axis=1, keepdims=True)                            # (C_out, 1)
    mu = s * (1.0 / l_out)
    d = y - mu
    sum_ref[...] = s
    m2_ref[...] = jnp.sum(d * d, axis=1, keepdims=True)


# ---------------------------------------------------------------------------
# Pass B: recompute conv tile, then fused scale*y + shift + ReLU, native layout.
# ---------------------------------------------------------------------------
def _conv_bn_relu_kernel(w_ref, x_ref, scale_ref, shift_ref, o_ref):
    k_taps = w_ref.shape[0]
    l_out = x_ref.shape[1] - k_taps + 1
    y = _conv_tile(w_ref, x_ref, l_out)                              # (C_out, L_out) f32
    o_ref[...] = jnp.maximum(
        y * scale_ref[...] + shift_ref[...], 0.0
    ).astype(o_ref.dtype)


def _pick_vmem_limit_bytes():
    """Generation-aware VMEM scope: ~half of physical, clamped to [32, 96] MiB."""
    try:
        cap = int(pltpu.get_tpu_info().vmem_capacity_bytes)
    except Exception:
        cap = 64 * 1024 * 1024
    return int(min(max(cap // 2, 32 * 1024 * 1024), 96 * 1024 * 1024))


def conv1d_block1_3(x, w, b, gamma, beta, eps=1e-5, *, matmul_dtype=jnp.bfloat16):
    """x: (N, C_in, L); w: (C_out, C_in, K); returns (N, C_out, L-K+1) float32.

    Matches PyTorch Conv1d(pad=0) -> BatchNorm1d (training-mode batch stats) -> ReLU.
    `b` is accepted for API fidelity but is mathematically cancelled by the
    training-mode BN mean subtraction, so it never enters the kernels.
    """
    del b  # exactly cancelled by training-mode BatchNorm mean subtraction (see header)
    N, C_in, L = x.shape
    C_out, _, K = w.shape
    L_out = L - K + 1

    # Tiny weight re-layout (K, C_out, C_in) in matmul dtype; resident in VMEM.
    w_k = jnp.transpose(w, (2, 0, 1)).astype(matmul_dtype)

    cparams = pltpu.CompilerParams(
        dimension_semantics=("parallel",),             # independent per-sample tiles
        vmem_limit_bytes=_pick_vmem_limit_bytes(),     # 32 MiB on v7x, 64 MiB v5e/v6e
    )

    x_bytes = x.size * x.dtype.itemsize
    w_bytes = w_k.size * jnp.dtype(matmul_dtype).itemsize
    conv_flops = 2 * N * C_out * C_in * K * L_out

    # ---------------- pass A: conv + per-sample BN partial stats ----------------
    cost_a = pl.CostEstimate(
        flops=conv_flops + 4 * N * C_out * L_out,
        transcendentals=0,
        bytes_accessed=x_bytes + w_bytes + 2 * N * C_out * 4,
    )
    tile_sum, tile_m2 = pl.pallas_call(
        _conv_stats_kernel,
        out_shape=(
            jax.ShapeDtypeStruct((N, C_out, 1), jnp.float32),
            jax.ShapeDtypeStruct((N, C_out, 1), jnp.float32),
        ),
        grid=(N,),
        in_specs=[
            pl.BlockSpec((K, C_out, C_in), lambda n: (0, 0, 0)),
            pl.BlockSpec((None, C_in, L), lambda n: (n, 0, 0)),
        ],
        out_specs=(
            pl.BlockSpec((None, C_out, 1), lambda n: (n, 0, 0)),
            pl.BlockSpec((None, C_out, 1), lambda n: (n, 0, 0)),
        ),
        compiler_params=cparams,
        cost_estimate=cost_a,
    )(w_k, x)

    # ------ combine per-tile (mean, M2) partials: Chan's parallel variance ------
    # Each tile covers exactly L_out valid positions, so the counts are equal.
    cnt = jnp.float32(L_out)
    tile_mean = tile_sum[:, :, 0] / cnt                      # (N, C_out)
    mean = jnp.mean(tile_mean, axis=0)                       # (C_out,)
    m2 = jnp.sum(tile_m2[:, :, 0], axis=0) + cnt * jnp.sum(
        (tile_mean - mean[None, :]) ** 2, axis=0)            # (C_out,)
    var = m2 / jnp.float32(N * L_out)                        # biased var (PyTorch train)
    inv_std = lax.rsqrt(var + jnp.float32(eps))
    scale = gamma.astype(jnp.float32) * inv_std
    shift = beta.astype(jnp.float32) - mean * scale
    scale2 = scale.reshape(C_out, 1)
    shift2 = shift.reshape(C_out, 1)

    # -------- pass B: recompute conv + BN affine + ReLU, native output layout --------
    cost_b = pl.CostEstimate(
        flops=conv_flops + 3 * N * C_out * L_out,
        transcendentals=0,
        bytes_accessed=x_bytes + w_bytes + N * C_out * L_out * 4 + 2 * C_out * 4,
    )
    out = pl.pallas_call(
        _conv_bn_relu_kernel,
        out_shape=jax.ShapeDtypeStruct((N, C_out, L_out), jnp.float32),
        grid=(N,),
        in_specs=[
            pl.BlockSpec((K, C_out, C_in), lambda n: (0, 0, 0)),
            pl.BlockSpec((None, C_in, L), lambda n: (n, 0, 0)),
            pl.BlockSpec((C_out, 1), lambda n: (0, 0)),
            pl.BlockSpec((C_out, 1), lambda n: (0, 0)),
        ],
        out_specs=pl.BlockSpec((None, C_out, L_out), lambda n: (n, 0, 0)),
        compiler_params=cparams,
        cost_estimate=cost_b,
    )(w_k, x, scale2, shift2)

    return out


def _reference(x, w, b, gamma, beta, eps=1e-5):
    """Pure-JAX reference mirroring PyTorch Conv1d + BatchNorm1d(train) + ReLU."""
    N, C_in, L = x.shape
    C_out, _, K = w.shape
    L_out = L - K + 1
    cols = jnp.stack([x[:, :, k:k + L_out] for k in range(K)], axis=2)  # (N,C_in,K,L_out)
    y = jnp.einsum("oik,nikl->nol", w, cols) + b[None, :, None]
    mean = jnp.mean(y, axis=(0, 2), keepdims=True)
    var = jnp.mean((y - mean) ** 2, axis=(0, 2), keepdims=True)
    y_hat = (y - mean) / jnp.sqrt(var + eps)
    out = y_hat * gamma[None, :, None] + beta[None, :, None]
    return jnp.maximum(out, 0.0)


if __name__ == "__main__":
    key = jax.random.PRNGKey(0)
    N, C_in, C_out, L, K = 2, 4, 8, 16, 3

    kx, kw, kb = jax.random.split(key, 3)
    x = jax.random.normal(kx, (N, C_in, L), dtype=jnp.float32)

    # Deterministic parameter init (PyTorch Conv1d default: U(-bound, bound))
    bound = 1.0 / (C_in * K) ** 0.5
    w = jax.random.uniform(kw, (C_out, C_in, K), minval=-bound, maxval=bound,
                           dtype=jnp.float32)
    b = jax.random.uniform(kb, (C_out,), minval=-bound, maxval=bound,
                           dtype=jnp.float32)
    # BatchNorm1d affine params (PyTorch default init: weight=1, bias=0)
    gamma = jnp.ones((C_out,), dtype=jnp.float32)
    beta = jnp.zeros((C_out,), dtype=jnp.float32)

    ref = _reference(x, w, b, gamma, beta)

    # Exactness check with f32 matmul inputs.
    out_f32 = jax.block_until_ready(
        conv1d_block1_3(x, w, b, gamma, beta, matmul_dtype=jnp.float32))
    assert out_f32.shape == (N, C_out, L - K + 1)
    assert jnp.allclose(out_f32, ref, atol=1e-4, rtol=1e-4), "f32 mismatch vs reference"

    # Default (bf16 MXU inputs, f32 accumulation) — looser tolerance.
    out = jax.block_until_ready(conv1d_block1_3(x, w, b, gamma, beta))
    assert out.shape == (N, C_out, L - K + 1)
    assert jnp.allclose(out, ref, atol=2e-2, rtol=2e-2), "bf16 mismatch vs reference"

    print("KERNEL_OK")
</pallas_src>

<mosaic_0001>
module attributes {stable_mosaic.version = 11 : i64} {
  func.func @_conv_stats_kernel(%arg0: i32, %arg1: memref<3x8x4xf32, #tpu.memory_space<vmem>>, %arg2: memref<1x4x16xf32, #tpu.memory_space<vmem>>, %arg3: memref<1x8x1xf32, #tpu.memory_space<vmem>>, %arg4: memref<1x8x1xf32, #tpu.memory_space<vmem>>) attributes {dimension_semantics = [#tpu.dimension_semantics<parallel>], iteration_bounds = array<i64: 2>, scalar_prefetch = 0 : i64, scratch_operands = 0 : i64, tpu.core_type = #tpu.core_type<tc>, window_params = [{pipeline_mode = #tpu.pipeline_mode<synchronous>, transform_indices = @transform_0, window_bounds = array<i64: 3, 8, 4>}, {transform_indices = @transform_1, window_bounds = array<i64: 1, 4, 16>}, {transform_indices = @transform_2, window_bounds = array<i64: 1, 8, 1>}, {transform_indices = @transform_3, window_bounds = array<i64: 1, 8, 1>}]} {
    %c0 = arith.constant 0 : index
    %c0_0 = arith.constant 0 : index
    %c0_1 = arith.constant 0 : index
    %0 = vector.load %arg2[%c0, %c0_0, %c0_1] : memref<1x4x16xf32, #tpu.memory_space<vmem>>, vector<1x4x14xf32>
    %1 = vector.shape_cast %0 : vector<1x4x14xf32> to vector<4x14xf32>
    %c0_2 = arith.constant 0 : index
    %c0_3 = arith.constant 0 : index
    %c0_4 = arith.constant 0 : index
    %2 = vector.load %arg1[%c0_2, %c0_3, %c0_4] : memref<3x8x4xf32, #tpu.memory_space<vmem>>, vector<1x8x4xf32>
    %3 = vector.shape_cast %2 : vector<1x8x4xf32> to vector<8x4xf32>
    %cst = arith.constant dense<0.000000e+00> : vector<8x14xf32>
    %4 = tpu.matmul %3, %1, %cst {dimension_numbers = #tpu.dot_dimension_numbers<[1], [0], [0], [1], [0, 0, 1, 1], [], []>} : vector<8x4xf32>, vector<4x14xf32>, vector<8x14xf32> -> vector<8x14xf32>
    %c0_5 = arith.constant 0 : index
    %c0_6 = arith.constant 0 : index
    %c1 = arith.constant 1 : index
    %5 = vector.load %arg2[%c0_5, %c0_6, %c1] : memref<1x4x16xf32, #tpu.memory_space<vmem>>, vector<1x4x14xf32>
    %6 = vector.shape_cast %5 : vector<1x4x14xf32> to vector<4x14xf32>
    %c1_7 = arith.constant 1 : index
    %c0_8 = arith.constant 0 : index
    %c0_9 = arith.constant 0 : index
    %7 = vector.load %arg1[%c1_7, %c0_8, %c0_9] : memref<3x8x4xf32, #tpu.memory_space<vmem>>, vector<1x8x4xf32>
    %8 = vector.shape_cast %7 : vector<1x8x4xf32> to vector<8x4xf32>
    %cst_10 = arith.constant dense<0.000000e+00> : vector<8x14xf32>
    %9 = tpu.matmul %8, %6, %cst_10 {dimension_numbers = #tpu.dot_dimension_numbers<[1], [0], [0], [1], [0, 0, 1, 1], [], []>} : vector<8x4xf32>, vector<4x14xf32>, vector<8x14xf32> -> vector<8x14xf32>
    %10 = arith.addf %4, %9 : vector<8x14xf32>
    %c0_11 = arith.constant 0 : index
    %c0_12 = arith.constant 0 : index
    %c2 = arith.constant 2 : index
    %11 = vector.load %arg2[%c0_11, %c0_12, %c2] : memref<1x4x16xf32, #tpu.memory_space<vmem>>, vector<1x4x14xf32>
    %12 = vector.shape_cast %11 : vector<1x4x14xf32> to vector<4x14xf32>
    %c2_13 = arith.constant 2 : index
    %c0_14 = arith.constant 0 : index
    %c0_15 = arith.constant 0 : index
    %13 = vector.load %arg1[%c2_13, %c0_14, %c0_15] : memref<3x8x4xf32, #tpu.memory_space<vmem>>, vector<1x8x4xf32>
    %14 = vector.shape_cast %13 : vector<1x8x4xf32> to vector<8x4xf32>
    %cst_16 = arith.constant dense<0.000000e+00> : vector<8x14xf32>
    %15 = tpu.matmul %14, %12, %cst_16 {dimension_numbers = #tpu.dot_dimension_numbers<[1], [0], [0], [1], [0, 0, 1, 1], [], []>} : vector<8x4xf32>, vector<4x14xf32>, vector<8x14xf32> -> vector<8x14xf32>
    %16 = arith.addf %10, %15 : vector<8x14xf32>
    %cst_17 = arith.constant dense<0.000000e+00> : vector<8xf32>
    %17 = vector.multi_reduction <add>, %16, %cst_17 [1] : vector<8x14xf32> to vector<8xf32>
    %18 = vector.shape_cast %17 : vector<8xf32> to vector<8x1xf32>
    %cst_18 = arith.constant 0.0714285746 : f32
    %19 = vector.broadcast %cst_18 : f32 to vector<8x1xf32>
    %20 = arith.mulf %18, %19 : vector<8x1xf32>
    %21 = vector.broadcast %20 : vector<8x1xf32> to vector<8x14xf32>
    %22 = arith.subf %16, %21 : vector<8x14xf32>
    %c0_19 = arith.constant 0 : index
    %c0_20 = arith.constant 0 : index
    %c0_21 = arith.constant 0 : index
    %23 = vector.load %arg3[%c0_19, %c0_20, %c0_21] : memref<1x8x1xf32, #tpu.memory_space<vmem>>, vector<1x8x1xf32>
    %24 = vector.shape_cast %23 : vector<1x8x1xf32> to vector<8x1xf32>
    %25 = vector.shape_cast %18 : vector<8x1xf32> to vector<1x8x1xf32>
    tpu.vector_store %arg3[%c0_19, %c0_20, %c0_21], %25 {strides = array<i32>} : memref<1x8x1xf32, #tpu.memory_space<vmem>>, vector<1x8x1xf32>,
    %26 = arith.mulf %22, %22 : vector<8x14xf32>
    %cst_22 = arith.constant dense<0.000000e+00> : vector<8xf32>
    %27 = vector.multi_reduction <add>, %26, %cst_22 [1] : vector<8x14xf32> to vector<8xf32>
    %28 = vector.shape_cast %27 : vector<8xf32> to vector<8x1xf32>
    %c0_23 = arith.constant 0 : index
    %c0_24 = arith.constant 0 : index
    %c0_25 = arith.constant 0 : index
    %29 = vector.load %arg4[%c0_23, %c0_24, %c0_25] : memref<1x8x1xf32, #tpu.memory_space<vmem>>, vector<1x8x1xf32>
    %30 = vector.shape_cast %29 : vector<1x8x1xf32> to vector<8x1xf32>
    %31 = vector.shape_cast %28 : vector<8x1xf32> to vector<1x8x1xf32>
    tpu.vector_store %arg4[%c0_23, %c0_24, %c0_25], %31 {strides = array<i32>} : memref<1x8x1xf32, #tpu.memory_space<vmem>>, vector<1x8x1xf32>,
    return
  }
  func.func @transform_0(%arg0: i32) -> (i32, i32, i32) {
    %c0_i32 = arith.constant 0 : i32
    %c0_i32_0 = arith.constant 0 : i32
    %c0_i32_1 = arith.constant 0 : i32
    %c0_i32_2 = arith.constant 0 : i32
    return %c0_i32, %c0_i32_0, %c0_i32_1 : i32, i32, i32
  }
  func.func @transform_1(%arg0: i32) -> (i32, i32, i32) {
    %c0_i32 = arith.constant 0 : i32
    %c0_i32_0 = arith.constant 0 : i32
    %c0_i32_1 = arith.constant 0 : i32
    return %arg0, %c0_i32, %c0_i32_0 : i32, i32, i32
  }
  func.func @transform_2(%arg0: i32) -> (i32, i32, i32) {
    %c0_i32 = arith.constant 0 : i32
    %c0_i32_0 = arith.constant 0 : i32
    %c0_i32_1 = arith.constant 0 : i32
    return %arg0, %c0_i32, %c0_i32_0 : i32, i32, i32
  }
  func.func @transform_3(%arg0: i32) -> (i32, i32, i32) {
    %c0_i32 = arith.constant 0 : i32
    %c0_i32_0 = arith.constant 0 : i32
    %c0_i32_1 = arith.constant 0 : i32
    return %arg0, %c0_i32, %c0_i32_0 : i32, i32, i32
  }
}

</mosaic_0001>

<bundles_post_ra>
// kernel: tpu_custom_call.1
= control target key start
LH: loop header
LB: loop body
LE: loop exit
PB: predicated region body
PF: predicated region fallthrough
CT: control target
= control target key end

     0   :  { %s421_s12 = smov 0   ;;  %s454_s0 = inlined_call_operand.vmem [shape: f32[3,8,4], index: 0, kind: input, shape index: {}]   ;;  %s455_s1 = inlined_call_operand.vmem [shape: f32[2,4,16], index: 1, kind: input, shape index: {}]   ;;  %s456_s2 = inlined_call_operand.vmem [shape: f32[2,8,1], index: 2, kind: output, shape index: {0}]   ;;  %s457_s3 = inlined_call_operand.vmem [shape: f32[2,8,1], index: 3, kind: output, shape index: {1}]  }
   0x1 LB: > { %s363_s13 = sadd.s32 4294967295, %s397_s12   ;;  %p367_p0 = scmp.ge.s32.totalorder %s397_s12, 1  ;;  %s397_s12 = sphi %s421_s12, %s14_s12  }
   0x2   : > { %p139_p1 = scmp.lt.s32.totalorder %s397_s12, 3 }
   0x4   : > { %p140_p2 = pnand %p367_p0, %p139_p1 }
   0x5   : > { %p165_p3 = scmp.lt.s32.totalorder (!%p140_p2), %s363_s13, 1  ;;  %s399_s18 = smov (!%p140_p2), 126  }
   0x6   : > { %143 = sbr.rel (%p140_p2) target bundleno = 510 (0x1fe), region = 28  ;;  %s400_s19 = smov (!%p140_p2), 127  }
   0xb   : > { %s459_s13 = smov (!%p165_p3, %s363_s13), 1  ;;  %vm188_vm0 = vcmask 1043456   ;;  %vm184_vm1 = vcmask 31744   ;;  %v178_v1 = vld [vmem:[%s454_s0] sm:$0xff]  ;;  %v376_v2 = vld [vmem:[%s454_s0 + $0x10] sm:$0xff]  ;;  %v371_v4 = vld [vmem:[%s454_s0 + $0x8] sm:$0xff] }
   0xc   : > { %s368_s14 = sshll.u32 %s459_s13, 2  ;;  %vm266_vm2 = vcmask 113664   ;;  %s369_s26 = sshll.u32 %s459_s13, 3  ;;  %vm272_vm3 = vcmask 7168  }
   0xd   : > { %s168_s17 = scalar_lea.vmem %s455_s1, %s368_s14  ;;  %s172_s29 = scalar_lea.vmem %s456_s2, %s369_s26 }
   0xe   : > { %v177_v0 = vld [vmem:[%s168_s17] sm:$0xf]  ;;  %s176_s5 = scalar_lea.vmem %s457_s3, %s369_s26 }
   0xf   : > { %238 = vrot.lane.b32.xlu0 %v177_v0, %s399_s18  ;;  %374 = vmatpush.msk.msra.mxu1 %vm188_vm0, %v177_v0 }
  0x10   : > { %375 = vmatmul.msk.f32.vlgmr.msra.gmra.mxu1 %vm184_vm1, %v178_v1 }
  0x17   : > { %182 = vrot.lane.b32.xlu0 %v177_v0, %s400_s19 }
  0x81   : > { %v239_v3 = vpop.permute.xlu0 %238 }
  0x82   : > { %377 = vmatpush.msk.msra.mxu2 %vm188_vm0, %v239_v3 }
  0x83   : > { %378 = vmatmul.msk.f32.vlgmr.msra.gmra.mxu2 %vm184_vm1, %v376_v2 }
  0x89   : > { %v183_v5 = vpop.permute.xlu0 %182 }
  0x8a   : > { %372 = vmatpush.msk.msra.mxu0 %vm188_vm0, %v183_v5 }
  0x8b   : > { %373 = vmatmul.msk.f32.vlgmr.msra.gmra.mxu0 %vm184_vm1, %v371_v4 }
  0x8d   : > { %v233_v6 = vpop.f32.mrf.mxu1 }
 0x106   : > { %v262_v8 = vpop.f32.mrf.mxu2 }
 0x108   : > { %v208_v7 = vpop.f32.mrf.mxu0 }
 0x109   : > { %v234_v9 = vadd.f32 %v233_v6, %v208_v7 }
 0x10b   : > { %v265_v10 = vadd.f32 %v262_v8, %v234_v9 }
 0x10d   : > { %v267_v11 = vsel %vm266_vm2, %v265_v10, 0.0 }
 0x10e   : > { %268 = vadd.xlane.f32.xlu1 %v267_v11 }
 0x181   : > { %v269_v12 = vpop.xlane.xlu1 %268 }
 0x182   : > { %v270_v13 = vmul.f32 0.071428575, %v269_v12  ;;  %273 = vst.msk [vmem:[%s172_s29] sm:$0xff] %vm272_vm3, %v269_v12 }
 0x184   : > { %v271_v14 = vsub.f32 %v265_v10, %v270_v13 }
 0x186   : > { %v274_v15 = vmul.f32 %v271_v14, %v271_v14 }
 0x188   : > { %v275_v16 = vsel %vm266_vm2, %v274_v15, 0.0 }
 0x189   : > { %276 = vadd.xlane.f32.xlu1 %v275_v16 }
 0x1fc   : > { %v277_v17 = vpop.xlane.xlu1 %276 }
 0x1fd   : > { %278 = vst.msk [vmem:[%s176_s5] sm:$0xff] %vm272_vm3, %v277_v17 }
 0x1fe PF: > { %s14_s12 = sadd.s32 1, %s397_s12  }
 0x1ff   : > { %p11_p4 = scmp.ge.s32.totalorder %s14_s12, 4  }
 0x201   :  { %13 = sbr.rel (!%p11_p4) target bundleno = 1 (0x1), region = 72 }

</bundles_post_ra>
